<compile_context>
chip_gen: v6e
topology: v6e:2x2x1
jax: 0.10.0
libtpu: 0.0.40
codegen_flags: <defaults>
</compile_context>

<pallas_src>
import functools

import jax
import jax.numpy as jnp
from jax.experimental import pallas as pl
from jax.experimental.pallas import tpu as pltpu


PACK = 8                               # entities per packed row: 8 * 16 coords = 128 lanes
TILE_ROWS = 4096                       # max packed rows per grid step (review: 2048-4096)
VMEM_BUDGET = 40 * 1024 * 1024         # budget used when auto-sizing the tile
VMEM_LIMIT_BYTES = 48 * 1024 * 1024    # <= ~48 MiB so the same kernel fits v7x (64 MiB VMEM)


def _round_up(v, m):
    return ((v + m - 1) // m) * m


# --------------------------------------------------------------------------- #
# Kernel: two fused bf16 matmuls (f32 accumulation), everything lane-dense.
# --------------------------------------------------------------------------- #
def bbox_mlp_kernel(x_ref, w1_ref, b1_ref, w2_ref, b2_ref, out_ref):
    # layer 1: per-box linear + ReLU for all PACK entities of each row at once.
    # Input streams in as f32 and is cast to bf16 in VMEM (MXU-native, no extra HBM pass).
    x = x_ref[...].astype(jnp.bfloat16)
    h = jnp.dot(x, w1_ref[...], preferred_element_type=jnp.float32) + b1_ref[...]
    h = jnp.maximum(h, 0.0).astype(jnp.bfloat16)
    # layer 2: aggregator (mean over the 3 boxes already folded into W2) + ReLU.
    y = jnp.dot(h, w2_ref[...], preferred_element_type=jnp.float32) + b2_ref[...]
    out_ref[...] = jnp.maximum(y, 0.0)


# --------------------------------------------------------------------------- #
# Parameters
# --------------------------------------------------------------------------- #
def init_params(key, embedding_size):
    """Deterministic synthetic parameters (torch.nn.Linear-style uniform init).

    Weights are stored transposed vs torch (shape (in, out)) so y = x @ W + b.
    """
    e2 = embedding_size // 2
    ks = jax.random.split(key, 6)

    def lin(kw, kb, fan_in, fan_out):
        bound = 1.0 / (fan_in ** 0.5)
        w = jax.random.uniform(kw, (fan_in, fan_out), jnp.float32, -bound, bound)
        b = jax.random.uniform(kb, (fan_out,), jnp.float32, -bound, bound)
        return w, b

    wa, ba = lin(ks[0], ks[1], 4, e2)                            # agent_fc
    wb, bb = lin(ks[2], ks[3], 4, e2)                            # box_fc
    wg, bg = lin(ks[4], ks[5], embedding_size, embedding_size)   # aggregator_fc
    return {"wa": wa, "ba": ba, "wb": wb, "bb": bb, "wg": wg, "bg": bg}


def prepare_packed_params(params, pack=PACK):
    """Fold the module into two matmuls and Kronecker-expand for PACK-entity packing.

    Returns (w1, b1, w2, b2): bf16 weights / f32 biases, plain arrays only (pack and
    embedding size are recoverable from the shapes, so nothing non-array crosses jit).
    Done once, outside the per-call path.
    """
    wa, ba = params["wa"], params["ba"]
    wb, bb = params["wb"], params["bb"]
    wg, bg = params["wg"], params["bg"]
    E = wg.shape[0]
    E2 = E // 2

    # layer-1 single-entity block: (16, 2E)  [agent | box1 | box2 | box3]
    w1 = jnp.zeros((16, 2 * E), jnp.float32)
    w1 = w1.at[0:4, 0 * E2:1 * E2].set(wa)
    w1 = w1.at[4:8, 1 * E2:2 * E2].set(wb)
    w1 = w1.at[8:12, 2 * E2:3 * E2].set(wb)
    w1 = w1.at[12:16, 3 * E2:4 * E2].set(wb)
    b1 = jnp.concatenate([ba, bb, bb, bb])

    # layer-2 single-entity block: (2E, E); mean over 3 boxes folded in as 1/3.
    w2 = jnp.concatenate(
        [wg[:E2, :], wg[E2:, :] / 3.0, wg[E2:, :] / 3.0, wg[E2:, :] / 3.0], axis=0)
    b2 = bg

    eye = jnp.eye(pack, dtype=jnp.float32)
    w1p = jnp.kron(eye, w1).astype(jnp.bfloat16)            # (16*pack, 2E*pack)
    w2p = jnp.kron(eye, w2).astype(jnp.bfloat16)            # (2E*pack, E*pack)
    b1p = jnp.tile(b1, pack)[None, :].astype(jnp.float32)   # (1, 2E*pack)
    b2p = jnp.tile(b2, pack)[None, :].astype(jnp.float32)   # (1, E*pack)
    return w1p, b1p, w2p, b2p


# --------------------------------------------------------------------------- #
# Forward
# --------------------------------------------------------------------------- #
@functools.partial(jax.jit, static_argnames=("tile_rows",))
def bbox_mlp_forward(x, w1, b1, w2, b2, tile_rows=TILE_ROWS):
    """x: (b, t, c, 4, 4) float32.  Returns (frames, embs) like the torch module."""
    b, t, c, hh, ww = x.shape
    assert hh == 4 and ww == 4, "BboxMlp expects 4 boxes x 4 coords per entity"
    in_dim, hid_dim = w1.shape
    out_dim = w2.shape[1]
    pack = in_dim // 16
    E = out_dim // pack
    N = b * t * c

    frames = x.reshape(b * t, c, hh, ww)      # free (contiguous) view
    x16 = x.reshape(N, 16)                    # free (contiguous) view

    # Pack `pack` entities per row.  Pad only up to PACK alignment (min 8 rows so the
    # (8,128) block rule always holds) -- NOT up to a multiple of the tile, so for
    # PACK-aligned N there is no wrapper-side pad copy at all.
    rows = max(pl.cdiv(N, pack), 8)
    n_pad = rows * pack
    if n_pad != N:
        x16 = jnp.pad(x16, ((0, n_pad - N), (0, 0)))
    xp = x16.reshape(rows, in_dim)            # (rows, 128) for pack=8

    # Tile rows: as large as the VMEM budget allows (amortizes the ~0.35us per-step
    # pipeline overhead), but split into >=2 grid steps when possible so the "parallel"
    # grid axis can feed both TensorCores on v7x.
    bytes_per_row = (2 * in_dim * 4          # double-buffered f32 input tile
                     + in_dim * 2            # in-kernel bf16 copy of the input tile
                     + hid_dim * (4 + 2)     # f32 + bf16 hidden temporaries
                     + 2 * out_dim * 4)      # double-buffered f32 output tile
    weight_bytes = (in_dim * hid_dim + hid_dim * out_dim) * 2 + (hid_dim + out_dim) * 4
    tr_cap = max(8, ((VMEM_BUDGET - weight_bytes) // bytes_per_row) // 8 * 8)
    tr = min(tile_rows, tr_cap, _round_up(pl.cdiv(rows, 2), 8))
    grid = (pl.cdiv(rows, tr),)               # ragged last tile: OOB rows never written back

    const_map = lambda i: (0, 0)
    out_packed = pl.pallas_call(
        bbox_mlp_kernel,
        out_shape=jax.ShapeDtypeStruct((rows, out_dim), jnp.float32),
        grid_spec=pltpu.PrefetchScalarGridSpec(
            num_scalar_prefetch=0,
            grid=grid,
            in_specs=[
                pl.BlockSpec((tr, in_dim), lambda i: (i, 0)),        # streamed input
                pl.BlockSpec((in_dim, hid_dim), const_map,           # resident W1
                             pipeline_mode=pl.Buffered(1)),
                pl.BlockSpec((1, hid_dim), const_map,                # resident b1
                             pipeline_mode=pl.Buffered(1)),
                pl.BlockSpec((hid_dim, out_dim), const_map,          # resident W2
                             pipeline_mode=pl.Buffered(1)),
                pl.BlockSpec((1, out_dim), const_map,                # resident b2
                             pipeline_mode=pl.Buffered(1)),
            ],
            out_specs=pl.BlockSpec((tr, out_dim), lambda i: (i, 0)),
        ),
        compiler_params=pltpu.CompilerParams(
            dimension_semantics=("parallel",),
            vmem_limit_bytes=VMEM_LIMIT_BYTES,
        ),
    )(xp, w1, b1, w2, b2)

    # Undo the packing (free contiguous reshape), drop any padding entities.
    embs = out_packed.reshape(n_pad, E)[:N].reshape(b, t, c * E)
    # TODO(synk): torch returns a SelfSupervisedOutputBbox dataclass; we return a tuple.
    return frames, embs


# --------------------------------------------------------------------------- #
# Pure-JAX reference (mirrors the PyTorch forward exactly, f32)
# --------------------------------------------------------------------------- #
def bbox_mlp_reference(x, params):
    b, t, c, hh, ww = x.shape
    E = params["wg"].shape[0]
    N = b * t * c
    frames = x.reshape(b * t, c, hh, ww)
    agent = frames[:, :, 0, :].reshape(N, 4)
    agent = jax.nn.relu(agent @ params["wa"] + params["ba"])
    box = frames[:, :, 1:, :].reshape(N * 3, 4)
    box = jax.nn.relu(box @ params["wb"] + params["bb"])
    box = box.reshape(N, 3, -1).mean(axis=1)
    agg = jax.nn.relu(jnp.concatenate([agent, box], axis=1) @ params["wg"]
                      + params["bg"])
    return frames, agg.reshape(b, t, c * E)


if __name__ == "__main__":
    embedding_size = 32
    key = jax.random.PRNGKey(0)
    k_p, k_x = jax.random.split(key)
    params = init_params(k_p, embedding_size)
    w1, b1, w2, b2 = prepare_packed_params(params, pack=PACK)

    # Two small shapes: a PACK-aligned one (no wrapper pad, 2 grid steps) and an
    # unaligned one that exercises the pad + ragged-last-tile path.
    for bb_, tt_, cc_ in [(2, 16, 8), (1, 7, 11)]:
        kx = jax.random.fold_in(k_x, bb_ * 1000 + tt_ * 100 + cc_)
        x = jax.random.normal(kx, (bb_, tt_, cc_, 4, 4), dtype=jnp.float32)

        frames, embs = bbox_mlp_forward(x, w1, b1, w2, b2)
        jax.block_until_ready((frames, embs))

        frames_ref, embs_ref = bbox_mlp_reference(x, params)
        assert frames.shape == (bb_ * tt_, cc_, 4, 4)
        assert embs.shape == (bb_, tt_, cc_ * embedding_size)
        assert jnp.allclose(frames, frames_ref)
        # bf16 weights/activations on the MXU (f32 accumulation) -> relaxed tolerance.
        max_err = float(jnp.max(jnp.abs(embs - embs_ref)))
        assert jnp.allclose(embs, embs_ref, atol=5e-2, rtol=5e-2), max_err

    print("KERNEL_OK")
</pallas_src>

<mosaic_0001>
module attributes {stable_mosaic.version = 11 : i64} {
  func.func @bbox_mlp_kernel(%arg0: i32, %arg1: memref<16x128xf32, #tpu.memory_space<vmem>>, %arg2: memref<128x512xbf16, #tpu.memory_space<vmem>>, %arg3: memref<1x512xf32, #tpu.memory_space<vmem>>, %arg4: memref<512x256xbf16, #tpu.memory_space<vmem>>, %arg5: memref<1x256xf32, #tpu.memory_space<vmem>>, %arg6: memref<16x256xf32, #tpu.memory_space<vmem>>) attributes {dimension_semantics = [#tpu.dimension_semantics<parallel>], iteration_bounds = array<i64: 2>, scalar_prefetch = 0 : i64, scratch_operands = 0 : i64, tpu.core_type = #tpu.core_type<tc>, window_params = [{transform_indices = @transform_0, window_bounds = array<i64: 16, 128>}, {pipeline_mode = #tpu.pipeline_mode<synchronous>, transform_indices = @transform_1, window_bounds = array<i64: 128, 512>}, {pipeline_mode = #tpu.pipeline_mode<synchronous>, transform_indices = @transform_2, window_bounds = array<i64: 1, 512>}, {pipeline_mode = #tpu.pipeline_mode<synchronous>, transform_indices = @transform_3, window_bounds = array<i64: 512, 256>}, {pipeline_mode = #tpu.pipeline_mode<synchronous>, transform_indices = @transform_4, window_bounds = array<i64: 1, 256>}, {transform_indices = @transform_5, window_bounds = array<i64: 16, 256>}]} {
    %c0 = arith.constant 0 : index
    %c0_0 = arith.constant 0 : index
    %0 = vector.load %arg1[%c0, %c0_0] : memref<16x128xf32, #tpu.memory_space<vmem>>, vector<16x128xf32>
    %1 = arith.truncf %0 : vector<16x128xf32> to vector<16x128xbf16>
    %c0_1 = arith.constant 0 : index
    %c0_2 = arith.constant 0 : index
    %2 = vector.load %arg2[%c0_1, %c0_2] : memref<128x512xbf16, #tpu.memory_space<vmem>>, vector<128x512xbf16>
    %cst = arith.constant dense<0.000000e+00> : vector<16x512xf32>
    %3 = tpu.matmul %1, %2, %cst {dimension_numbers = #tpu.dot_dimension_numbers<[1], [0], [0], [1], [0, 0, 1, 1], [], []>} : vector<16x128xbf16>, vector<128x512xbf16>, vector<16x512xf32> -> vector<16x512xf32>
    %c0_3 = arith.constant 0 : index
    %c0_4 = arith.constant 0 : index
    %4 = vector.load %arg3[%c0_3, %c0_4] : memref<1x512xf32, #tpu.memory_space<vmem>>, vector<1x512xf32>
    %5 = vector.broadcast %4 : vector<1x512xf32> to vector<16x512xf32>
    %6 = arith.addf %3, %5 : vector<16x512xf32>
    %cst_5 = arith.constant 0.000000e+00 : f32
    %7 = vector.broadcast %cst_5 : f32 to vector<16x512xf32>
    %8 = arith.maximumf %6, %7 : vector<16x512xf32>
    %9 = arith.truncf %8 : vector<16x512xf32> to vector<16x512xbf16>
    %c0_6 = arith.constant 0 : index
    %c0_7 = arith.constant 0 : index
    %10 = vector.load %arg4[%c0_6, %c0_7] : memref<512x256xbf16, #tpu.memory_space<vmem>>, vector<512x256xbf16>
    %cst_8 = arith.constant dense<0.000000e+00> : vector<16x256xf32>
    %11 = tpu.matmul %9, %10, %cst_8 {dimension_numbers = #tpu.dot_dimension_numbers<[1], [0], [0], [1], [0, 0, 1, 1], [], []>} : vector<16x512xbf16>, vector<512x256xbf16>, vector<16x256xf32> -> vector<16x256xf32>
    %c0_9 = arith.constant 0 : index
    %c0_10 = arith.constant 0 : index
    %12 = vector.load %arg5[%c0_9, %c0_10] : memref<1x256xf32, #tpu.memory_space<vmem>>, vector<1x256xf32>
    %13 = vector.broadcast %12 : vector<1x256xf32> to vector<16x256xf32>
    %14 = arith.addf %11, %13 : vector<16x256xf32>
    %cst_11 = arith.constant 0.000000e+00 : f32
    %15 = vector.broadcast %cst_11 : f32 to vector<16x256xf32>
    %16 = arith.maximumf %14, %15 : vector<16x256xf32>
    %c0_12 = arith.constant 0 : index
    %c0_13 = arith.constant 0 : index
    %17 = vector.load %arg6[%c0_12, %c0_13] : memref<16x256xf32, #tpu.memory_space<vmem>>, vector<16x256xf32>
    tpu.vector_store %arg6[%c0_12, %c0_13], %16 {strides = array<i32>} : memref<16x256xf32, #tpu.memory_space<vmem>>, vector<16x256xf32>,
    return
  }
  func.func @transform_0(%arg0: i32) -> (i32, i32) {
    %c0_i32 = arith.constant 0 : i32
    %c0_i32_0 = arith.constant 0 : i32
    return %arg0, %c0_i32 : i32, i32
  }
  func.func @transform_1(%arg0: i32) -> (i32, i32) {
    %c0_i32 = arith.constant 0 : i32
    %c0_i32_0 = arith.constant 0 : i32
    %c0_i32_1 = arith.constant 0 : i32
    return %c0_i32, %c0_i32_0 : i32, i32
  }
  func.func @transform_2(%arg0: i32) -> (i32, i32) {
    %c0_i32 = arith.constant 0 : i32
    %c0_i32_0 = arith.constant 0 : i32
    %c0_i32_1 = arith.constant 0 : i32
    return %c0_i32, %c0_i32_0 : i32, i32
  }
  func.func @transform_3(%arg0: i32) -> (i32, i32) {
    %c0_i32 = arith.constant 0 : i32
    %c0_i32_0 = arith.constant 0 : i32
    %c0_i32_1 = arith.constant 0 : i32
    return %c0_i32, %c0_i32_0 : i32, i32
  }
  func.func @transform_4(%arg0: i32) -> (i32, i32) {
    %c0_i32 = arith.constant 0 : i32
    %c0_i32_0 = arith.constant 0 : i32
    %c0_i32_1 = arith.constant 0 : i32
    return %c0_i32, %c0_i32_0 : i32, i32
  }
  func.func @transform_5(%arg0: i32) -> (i32, i32) {
    %c0_i32 = arith.constant 0 : i32
    %c0_i32_0 = arith.constant 0 : i32
    return %arg0, %c0_i32 : i32, i32
  }
}

</mosaic_0001>

<bundles_post_ra>
// kernel: bbox_mlp_forward.1
= control target key start
LH: loop header
LB: loop body
LE: loop exit
PB: predicated region body
PF: predicated region fallthrough
CT: control target
= control target key end

     0   :  { %10 = vsyncpa [#allocation3], 0  ;;  %s1901_s0 = inlined_call_operand.vmem [shape: f32[32,128], index: 0, kind: input, shape index: {}]   ;;  %s1902_s1 = inlined_call_operand.vmem [shape: bf16[128,512], index: 1, kind: input, shape index: {}]   ;;  %s1903_s2 = inlined_call_operand.vmem [shape: f32[1,512], index: 2, kind: input, shape index: {}]   ;;  %s1904_s3 = inlined_call_operand.vmem [shape: bf16[512,256], index: 3, kind: input, shape index: {}]   ;;  %s1905_s4 = inlined_call_operand.vmem [shape: f32[1,256], index: 4, kind: input, shape index: {}]   ;;  %s1906_s5 = inlined_call_operand.hbm [shape: f32[32,256], index: 5, kind: output, shape index: {}]  }
   0x1   :  { %12 = vsyncpa [#allocation3 + $0x1], 0  ;;  %s1502_s18 = smov 0   ;;  %s1504_s19 = smov 0  }
   0x2   :  { %s1506_s20 = smov 0   ;;  %s1508_s21 = smov 0  }
   0x3 LB: > { %s1523_s22 = sadd.s32 4294967295, %s1466_s21   ;;  %s1109_s23 = sadd.s32 4294967294, %s1466_s21   ;;  %s1466_s21 = sphi %s1508_s21, %s1912_s21   ;;  %s1462_s20 = sphi %s1506_s20, %s1911_s20   ;;  %s1458_s19 = sphi %s1504_s19, %s1910_s19   ;;  %s1454_s18 = sphi %s1502_s18, %s1909_s18  }
   0x4   : > { %s1527_s24 = sadd.s32 1, %s1466_s21   ;;  %s135_s25 = sadd.s32 1, %s1462_s20 }
   0x5   : > { %s132_s26 = ssub.s32 %s1466_s21, %s1527_s24  ;;  %p145_p0 = scmp.ne.s32.totalorder %s1462_s20, %s1458_s19 }
   0x6   : > { %p133_p1 = scmp.eq.s32.totalorder %s132_s26, 0  ;;  %p146_p2 = scmp.eq.s32.totalorder %s1523_s22, 1 }
   0x7   : > { %p151_p3 = scmp.ne.s32.totalorder %s1458_s19, %s1454_s18  ;;  %p152_p4 = scmp.eq.s32.totalorder %s1109_s23, 1 }
   0x8   : > { %s1538_s27 = scalar_select %p133_p1, %s1462_s20, %s135_s25  }
   0x9   : > { %p1540_p5 = por %p146_p2, %p145_p0  ;;  %p1544_p6 = por %p152_p4, %p151_p3 }
   0xa   : > { %p1112_p7 = scmp.ge.s32.totalorder %s1466_s21, 1  ;;  %p191_p8 = scmp.lt.s32.totalorder %s1466_s21, 3 }
   0xc   : > { %p192_p9 = pnand %p1112_p7, %p191_p8 }
   0xd   : > { %s1114_s25 = sshll.u32 (!%p192_p9), %s1523_s22, 1  ;;  %s216_s15 = sand.u32 (!%p192_p9), 1, %s1458_s19  }
   0xe   : > { %195 = sbr.rel (%p192_p9) target bundleno = 478 (0x1de), region = 40  ;;  %p220_p10 = scmp.lt.s32.totalorder (!%p192_p9), %s1114_s25, 3 }
   0xf   : > { %s1113_s16 = sshll.u32 (!%p192_p9), %s216_s15, 5  ;;  %s1219_s26 = sshll.u32 (!%p192_p9), %s1523_s22, 9 }
  0x10   : > { %s218_s17 = scalar_lea.vmem (!%p192_p9), [#allocation2], %s1113_s16  ;;  %s1861_s7 = scalar_lea.sflag (!%p192_p9), [#allocation3], %s216_s15 }
  0x11   : > { %s1047_s23 = sshll.u32 (!%p192_p9), %s218_s17, 4  ;;  %s1469_s8 = smov (!%p192_p9), [#allocation2]   ;;  %s1852_s23 = int_to_ptr.vmem [resolvable:$true] %s1047_s23 }
  0x12   : > { %s1406_s22 = scalar_lea.vmem (!%p192_p9), %s1852_s23, 512  ;;  %s1410_s9 = sshll.u32 (!%p192_p9), %s1469_s8, 4  ;;  %s1411_s9 = int_to_ptr.vmem [resolvable:$false] %s1410_s9 }
  0x13   : > { %v1262_v0 = vld [vmem:[%s1902_s1 + $0xe4] ss:$16 sps:$4 sm:$0xff]   ;;  %v1264_v1 = vld [vmem:[%s1902_s1 + $0xec] ss:$16 sps:$4 sm:$0xff]   ;;  %v1468_v2 = vmov 0   ;;  %s1914_s25 = smov (!%p220_p10, %s1114_s25), 3  ;;  %p1407_p11 = scmp.ne.s32.totalorder %s1852_s23, %s1406_s22 }
  0x14   : > { %476 = vmatprep.mubr.bf16.mxu0 %v1468_v2  ;;  %519 = vmatprep.mubr.bf16.mxu1 %v1468_v2  ;;  %v1266_v3 = vld [vmem:[%s1902_s1 + $0xe0] ss:$16 sps:$4 sm:$0xff]   ;;  %v1267_v4 = vld [vmem:[%s1902_s1 + $0xe8] ss:$16 sps:$4 sm:$0xff]   ;;  %v1268_v5 = vld [vmem:[%s1902_s1 + $0xc4] ss:$16 sps:$4 sm:$0xff]   ;;  %p1413_p0 = scmp.lt.s32.totalorder %s1852_s23, %s1411_s9 }
  0x15   : > { %444 = vmatprep.subr.bf16.mxu0 %v1262_v0  ;;  %487 = vmatprep.subr.bf16.mxu1 %v1264_v1  ;;  %v1270_v6 = vld [vmem:[%s1902_s1 + $0xcc] ss:$16 sps:$4 sm:$0xff]   ;;  %v1272_v7 = vld [vmem:[%s1902_s1 + $0xc0] ss:$16 sps:$4 sm:$0xff]   ;;  %v1273_v8 = vld [vmem:[%s1902_s1 + $0xc8] ss:$16 sps:$4 sm:$0xff]   ;;  %p1408_p12 = pnand %p1407_p11, %p1540_p5 }
  0x16   : > { %445 = vmatpush1.bf16.msra.mxu0 %v1266_v3  ;;  %488 = vmatpush1.bf16.msra.mxu1 %v1267_v4  ;;  %v1274_v9 = vld [vmem:[%s1902_s1 + $0xa4] ss:$16 sps:$4 sm:$0xff]   ;;  %v1276_v10 = vld [vmem:[%s1902_s1 + $0xac] ss:$16 sps:$4 sm:$0xff]   ;;  %v1278_v11 = vld [vmem:[%s1902_s1 + $0xa0] ss:$16 sps:$4 sm:$0xff]  }
  0x17   : > { %446 = vmatprep.subr.bf16.mxu0 %v1268_v5  ;;  %489 = vmatprep.subr.bf16.mxu1 %v1270_v6  ;;  %v1279_v12 = vld [vmem:[%s1902_s1 + $0xa8] ss:$16 sps:$4 sm:$0xff]   ;;  %v1280_v13 = vld [vmem:[%s1902_s1 + $0x84] ss:$16 sps:$4 sm:$0xff]   ;;  %v1282_v14 = vld [vmem:[%s1902_s1 + $0x8c] ss:$16 sps:$4 sm:$0xff]   ;;  %p1409_p13 = pneg %p1408_p12 }
  0x18   : > { %v1284_v15 = vld [vmem:[%s1902_s1 + $0x80] ss:$16 sps:$4 sm:$0xff]   ;;  %v1285_v16 = vld [vmem:[%s1902_s1 + $0x88] ss:$16 sps:$4 sm:$0xff]   ;;  %v1286_v17 = vld [vmem:[%s1902_s1 + $0x64] ss:$16 sps:$4 sm:$0xff]  }
  0x19   : > { %v1288_v18 = vld [vmem:[%s1902_s1 + $0x6c] ss:$16 sps:$4 sm:$0xff]   ;;  %v1290_v19 = vld [vmem:[%s1902_s1 + $0x60] ss:$16 sps:$4 sm:$0xff]   ;;  %v1291_v20 = vld [vmem:[%s1902_s1 + $0x68] ss:$16 sps:$4 sm:$0xff]  }
  0x1a   : > { %447 = vmatpush1.bf16.msra.mxu0 %v1272_v7  ;;  %490 = vmatpush1.bf16.msra.mxu1 %v1273_v8  ;;  %v1292_v21 = vld [vmem:[%s1902_s1 + $0x44] ss:$16 sps:$4 sm:$0xff]   ;;  %v1294_v22 = vld [vmem:[%s1902_s1 + $0x4c] ss:$16 sps:$4 sm:$0xff]   ;;  %v1296_v23 = vld [vmem:[%s1902_s1 + $0x40] ss:$16 sps:$4 sm:$0xff]  }
  0x1b   : > { %448 = vmatprep.subr.bf16.mxu0 %v1274_v9  ;;  %491 = vmatprep.subr.bf16.mxu1 %v1276_v10  ;;  %v1297_v24 = vld [vmem:[%s1902_s1 + $0x48] ss:$16 sps:$4 sm:$0xff]   ;;  %v1298_v25 = vld [vmem:[%s1902_s1 + $0x24] ss:$16 sps:$4 sm:$0xff]   ;;  %v1300_v26 = vld [vmem:[%s1902_s1 + $0x2c] ss:$16 sps:$4 sm:$0xff]  }
  0x1c   : > { %s1115_s11 = sshll.u32 %s1914_s25, 3  ;;  %v1302_v27 = vld [vmem:[%s1902_s1 + $0x20] ss:$16 sps:$4 sm:$0xff]   ;;  %v1303_v28 = vld [vmem:[%s1902_s1 + $0x28] ss:$16 sps:$4 sm:$0xff]   ;;  %s1412_s10 = scalar_lea.vmem %s1411_s9, 1024 }
  0x1d   : > { %v1304_v29 = vld [vmem:[%s1902_s1 + $0x4] ss:$16 sps:$4 sm:$0xff]   ;;  %v1306_v30 = vld [vmem:[%s1902_s1 + $0xc] ss:$16 sps:$4 sm:$0xff]   ;;  %s223_s6 = scalar_lea.vmem %s1901_s0, %s1115_s11  ;;  %v1308_v31 = vld [vmem:[%s1902_s1] ss:$16 sps:$4 sm:$0xff]   ;;  %p1414_p1 = scmp.lt.s32.totalorder %s1412_s10, %s1406_s22 }
  0x1e   : > { %449 = vmatpush1.bf16.msra.mxu0 %v1278_v11  ;;  %492 = vmatpush1.bf16.msra.mxu1 %v1279_v12  ;;  %v1309_v32 = vld [vmem:[%s1902_s1 + $0x8] ss:$16 sps:$4 sm:$0xff]   ;;  %v227_v33 = vld [vmem:[%s223_s6] sm:$0xff]  ;;  %v1312_v35 = vld [vmem:[%s1904_s3 + $0x74] ss:$8 sps:$4 sm:$0xff]  }
  0x1f   : > { %450 = vmatprep.subr.bf16.mxu0 %v1280_v13  ;;  %493 = vmatprep.subr.bf16.mxu1 %v1282_v14  ;;  %v228_v34 = vld [vmem:[%s223_s6 + $0x8] sm:$0xff]  ;;  %v1315_v36 = vld [vmem:[%s1904_s3 + $0x174] ss:$8 sps:$4 sm:$0xff]   ;;  %v1310_v38 = vld [vmem:[%s1904_s3 + $0x70] ss:$8 sps:$4 sm:$0xff]   ;;  %s1857_s6 = scalar_lea.hbm %s1906_s5, %s1219_s26  ;;  %p1415_p2 = por %p1414_p1, %p1413_p0 }
  0x20   : > { %v229_v37 = vpack.c.bf16 %v228_v34, %v227_v33  ;;  %v1313_v39 = vld [vmem:[%s1904_s3 + $0x170] ss:$8 sps:$4 sm:$0xff]   ;;  %v1318_v40 = vld [vmem:[%s1904_s3 + $0x64] ss:$8 sps:$4 sm:$0xff]   ;;  %v1316_v42 = vld [vmem:[%s1904_s3 + $0x60] ss:$8 sps:$4 sm:$0xff]  }
  0x21   : > { %v1321_v41 = vld [vmem:[%s1904_s3 + $0x164] ss:$8 sps:$4 sm:$0xff]   ;;  %v1319_v43 = vld [vmem:[%s1904_s3 + $0x160] ss:$8 sps:$4 sm:$0xff]   ;;  %v1324_v44 = vld [vmem:[%s1904_s3 + $0x54] ss:$8 sps:$4 sm:$0xff]   ;;  %p1416_p3 = pnand %p1415_p2, %p1409_p13 }
  0x22   : > { %451 = vmatpush1.bf16.msra.mxu0 %v1284_v15  ;;  %494 = vmatpush1.bf16.msra.mxu1 %v1285_v16  ;;  %v1327_v45 = vld [vmem:[%s1904_s3 + $0x154] ss:$8 sps:$4 sm:$0xff]   ;;  %v1322_v46 = vld [vmem:[%s1904_s3 + $0x50] ss:$8 sps:$4 sm:$0xff]   ;;  %v1330_v48 = vld [vmem:[%s1904_s3 + $0x44] ss:$8 sps:$4 sm:$0xff]  }
  0x23   : > { %452 = vmatprep.subr.bf16.mxu0 %v1286_v17  ;;  %495 = vmatprep.subr.bf16.mxu1 %v1288_v18  ;;  %v1325_v47 = vld [vmem:[%s1904_s3 + $0x150] ss:$8 sps:$4 sm:$0xff]   ;;  %v1333_v49 = vld [vmem:[%s1904_s3 + $0x144] ss:$8 sps:$4 sm:$0xff]   ;;  %v1328_v50 = vld [vmem:[%s1904_s3 + $0x40] ss:$8 sps:$4 sm:$0xff]  }
  0x24   : > { %v1331_v51 = vld [vmem:[%s1904_s3 + $0x140] ss:$8 sps:$4 sm:$0xff]   ;;  %v1336_v52 = vld [vmem:[%s1904_s3 + $0x34] ss:$8 sps:$4 sm:$0xff]   ;;  %v1334_v54 = vld [vmem:[%s1904_s3 + $0x30] ss:$8 sps:$4 sm:$0xff]  }
  0x25   : > { %v1339_v53 = vld [vmem:[%s1904_s3 + $0x134] ss:$8 sps:$4 sm:$0xff]   ;;  %v1337_v55 = vld [vmem:[%s1904_s3 + $0x130] ss:$8 sps:$4 sm:$0xff]   ;;  %v1342_v56 = vld [vmem:[%s1904_s3 + $0x24] ss:$8 sps:$4 sm:$0xff]  }
  0x26   : > { %453 = vmatpush1.bf16.msra.mxu0 %v1290_v19  ;;  %496 = vmatpush1.bf16.msra.mxu1 %v1291_v20  ;;  %v1345_v57 = vld [vmem:[%s1904_s3 + $0x124] ss:$8 sps:$4 sm:$0xff]   ;;  %v1340_v58 = vld [vmem:[%s1904_s3 + $0x20] ss:$8 sps:$4 sm:$0xff]   ;;  %v1348_v60 = vld [vmem:[%s1904_s3 + $0x14] ss:$8 sps:$4 sm:$0xff]  }
  0x27   : > { %454 = vmatprep.subr.bf16.mxu0 %v1292_v21  ;;  %497 = vmatprep.subr.bf16.mxu1 %v1294_v22  ;;  %v1343_v59 = vld [vmem:[%s1904_s3 + $0x120] ss:$8 sps:$4 sm:$0xff]   ;;  %v1351_v61 = vld [vmem:[%s1904_s3 + $0x114] ss:$8 sps:$4 sm:$0xff]   ;;  %v1346_v62 = vld [vmem:[%s1904_s3 + $0x10] ss:$8 sps:$4 sm:$0xff]  }
  0x28   : > { %v1349_v63 = vld [vmem:[%s1904_s3 + $0x110] ss:$8 sps:$4 sm:$0xff]   ;;  %v1354_v0 = vld [vmem:[%s1904_s3 + $0x4] ss:$8 sps:$4 sm:$0xff]   ;;  %v1352_v2 = vld [vmem:[%s1904_s3] ss:$8 sps:$4 sm:$0xff]  }
  0x29   : > { %v1357_v1 = vld [vmem:[%s1904_s3 + $0x104] ss:$8 sps:$4 sm:$0xff]   ;;  %v1355_v3 = vld [vmem:[%s1904_s3 + $0x100] ss:$8 sps:$4 sm:$0xff]   ;;  %v1360_v4 = vld [vmem:[%s1904_s3 + $0xf4] ss:$8 sps:$4 sm:$0xff]  }
  0x2a   : > { %455 = vmatpush1.bf16.msra.mxu0 %v1296_v23  ;;  %498 = vmatpush1.bf16.msra.mxu1 %v1297_v24  ;;  %v1363_v5 = vld [vmem:[%s1904_s3 + $0x1f4] ss:$8 sps:$4 sm:$0xff]   ;;  %v1358_v6 = vld [vmem:[%s1904_s3 + $0xf0] ss:$8 sps:$4 sm:$0xff]   ;;  %v1366_v8 = vld [vmem:[%s1904_s3 + $0xe4] ss:$8 sps:$4 sm:$0xff]  }
  0x2b   : > { %456 = vmatprep.subr.bf16.mxu0 %v1298_v25  ;;  %499 = vmatprep.subr.bf16.mxu1 %v1300_v26  ;;  %v1361_v7 = vld [vmem:[%s1904_s3 + $0x1f0] ss:$8 sps:$4 sm:$0xff]   ;;  %v1369_v9 = vld [vmem:[%s1904_s3 + $0x1e4] ss:$8 sps:$4 sm:$0xff]   ;;  %v1364_v10 = vld [vmem:[%s1904_s3 + $0xe0] ss:$8 sps:$4 sm:$0xff]  }
  0x2c   : > { %v1367_v11 = vld [vmem:[%s1904_s3 + $0x1e0] ss:$8 sps:$4 sm:$0xff]   ;;  %v1372_v12 = vld [vmem:[%s1904_s3 + $0xd4] ss:$8 sps:$4 sm:$0xff]   ;;  %v1370_v14 = vld [vmem:[%s1904_s3 + $0xd0] ss:$8 sps:$4 sm:$0xff]  }
  0x2d   : > { %v1375_v13 = vld [vmem:[%s1904_s3 + $0x1d4] ss:$8 sps:$4 sm:$0xff]   ;;  %v1373_v15 = vld [vmem:[%s1904_s3 + $0x1d0] ss:$8 sps:$4 sm:$0xff]   ;;  %v1378_v16 = vld [vmem:[%s1904_s3 + $0xc4] ss:$8 sps:$4 sm:$0xff]  }
  0x2e   : > { %457 = vmatpush1.bf16.msra.mxu0 %v1302_v27  ;;  %500 = vmatpush1.bf16.msra.mxu1 %v1303_v28  ;;  %v1381_v17 = vld [vmem:[%s1904_s3 + $0x1c4] ss:$8 sps:$4 sm:$0xff]   ;;  %v1376_v18 = vld [vmem:[%s1904_s3 + $0xc0] ss:$8 sps:$4 sm:$0xff]   ;;  %v1384_v20 = vld [vmem:[%s1904_s3 + $0xb4] ss:$8 sps:$4 sm:$0xff]  }
  0x2f   : > { %458 = vmatprep.subr.bf16.mxu0 %v1304_v29  ;;  %501 = vmatprep.subr.bf16.mxu1 %v1306_v30  ;;  %v1379_v19 = vld [vmem:[%s1904_s3 + $0x1c0] ss:$8 sps:$4 sm:$0xff]   ;;  %v1387_v21 = vld [vmem:[%s1904_s3 + $0x1b4] ss:$8 sps:$4 sm:$0xff]   ;;  %v1382_v22 = vld [vmem:[%s1904_s3 + $0xb0] ss:$8 sps:$4 sm:$0xff]  }
  0x30   : > { %v1385_v23 = vld [vmem:[%s1904_s3 + $0x1b0] ss:$8 sps:$4 sm:$0xff]   ;;  %v1390_v24 = vld [vmem:[%s1904_s3 + $0xa4] ss:$8 sps:$4 sm:$0xff]   ;;  %v1388_v26 = vld [vmem:[%s1904_s3 + $0xa0] ss:$8 sps:$4 sm:$0xff]  }
  0x31   : > { %v1393_v25 = vld [vmem:[%s1904_s3 + $0x1a4] ss:$8 sps:$4 sm:$0xff]   ;;  %v1391_v27 = vld [vmem:[%s1904_s3 + $0x1a0] ss:$8 sps:$4 sm:$0xff]   ;;  %v1396_v28 = vld [vmem:[%s1904_s3 + $0x94] ss:$8 sps:$4 sm:$0xff]  }
  0x32   : > { %459 = vmatpush1.bf16.msra.mxu0 %v1308_v31  ;;  %502 = vmatpush1.bf16.msra.mxu1 %v1309_v32  ;;  %v1399_v29 = vld [vmem:[%s1904_s3 + $0x194] ss:$8 sps:$4 sm:$0xff]   ;;  %v1394_v30 = vld [vmem:[%s1904_s3 + $0x90] ss:$8 sps:$4 sm:$0xff]   ;;  %v1402_v32 = vld [vmem:[%s1904_s3 + $0x84] ss:$8 sps:$4 sm:$0xff]  }
  0x33   : > { %938 = vmatprep.subr.bf16.mxu0 %v1312_v35  ;;  %981 = vmatprep.subr.bf16.mxu1 %v1315_v36  ;;  %v1397_v31 = vld [vmem:[%s1904_s3 + $0x190] ss:$8 sps:$4 sm:$0xff]   ;;  %v1405_v33 = vld [vmem:[%s1904_s3 + $0x184] ss:$8 sps:$4 sm:$0xff]   ;;  %v1400_v34 = vld [vmem:[%s1904_s3 + $0x80] ss:$8 sps:$4 sm:$0xff]   ;;  %v264_v36 = vlaneseq }
  0x34   : > { %v1403_v35 = vld [vmem:[%s1904_s3 + $0x180] ss:$8 sps:$4 sm:$0xff]  }
  0x35   : > { %477 = vmatmul.mubr.bf16.vlgmr.msra.gmra.mxu0 %v229_v37  ;;  %520 = vmatmul.mubr.bf16.vlgmr.msra.gmra.mxu1 %v229_v37  ;;  %v265_v37 = vshrl.u32 %v264_v36, 7 }
  0x36   : > { %939 = vmatpush1.bf16.msra.mxu0 %v1310_v38  ;;  %982 = vmatpush1.bf16.msra.mxu1 %v1313_v39 }
  0x37   : > { %940 = vmatprep.subr.bf16.mxu0 %v1318_v40  ;;  %983 = vmatprep.subr.bf16.mxu1 %v1321_v41  ;;  %v270_v38 = vsub.s32 1, %v265_v37  ;;  %v278_v39 = vsub.s32 3, %v265_v37  ;;  %v266_v40 = vsub.s32 0, %v265_v37  ;;  %v274_v41 = vsub.s32 2, %v265_v37 }
  0x3a   : > { %941 = vmatpush1.bf16.msra.mxu0 %v1316_v42  ;;  %984 = vmatpush1.bf16.msra.mxu1 %v1319_v43  ;;  %v262_v42 = vld [vmem:[%s1903_s2] sm:$0xf] }
  0x3b   : > { %942 = vmatprep.subr.bf16.mxu0 %v1324_v44  ;;  %985 = vmatprep.subr.bf16.mxu1 %v1327_v45  ;;  %v271_v45 = vrot.slane %v262_v42, %v270_v38 }
  0x3e   : > { %943 = vmatpush1.bf16.msra.mxu0 %v1322_v46  ;;  %986 = vmatpush1.bf16.msra.mxu1 %v1325_v47  ;;  %v279_v46 = vrot.slane %v262_v42, %v278_v39  ;;  %v267_v47 = vrot.slane %v262_v42, %v266_v40 }
  0x3f   : > { %944 = vmatprep.subr.bf16.mxu0 %v1330_v48  ;;  %987 = vmatprep.subr.bf16.mxu1 %v1333_v49  ;;  %v275_v48 = vrot.slane %v262_v42, %v274_v41 }
  0x42   : > { %945 = vmatpush1.bf16.msra.mxu0 %v1328_v50  ;;  %988 = vmatpush1.bf16.msra.mxu1 %v1331_v51 }
  0x43   : > { %946 = vmatprep.subr.bf16.mxu0 %v1336_v52  ;;  %989 = vmatprep.subr.bf16.mxu1 %v1339_v53 }
  0x46   : > { %947 = vmatpush1.bf16.msra.mxu0 %v1334_v54  ;;  %990 = vmatpush1.bf16.msra.mxu1 %v1337_v55 }
  0x47   : > { %948 = vmatprep.subr.bf16.mxu0 %v1342_v56  ;;  %991 = vmatprep.subr.bf16.mxu1 %v1345_v57 }
  0x4a   : > { %949 = vmatpush1.bf16.msra.mxu0 %v1340_v58  ;;  %992 = vmatpush1.bf16.msra.mxu1 %v1343_v59 }
  0x4b   : > { %950 = vmatprep.subr.bf16.mxu0 %v1348_v60  ;;  %993 = vmatprep.subr.bf16.mxu1 %v1351_v61 }
  0x4e   : > { %951 = vmatpush1.bf16.msra.mxu0 %v1346_v62  ;;  %994 = vmatpush1.bf16.msra.mxu1 %v1349_v63 }
  0x4f   : > { %952 = vmatprep.subr.bf16.mxu0 %v1354_v0  ;;  %995 = vmatprep.subr.bf16.mxu1 %v1357_v1 }
  0x52   : > { %953 = vmatpush1.bf16.msra.mxu0 %v1352_v2  ;;  %996 = vmatpush1.bf16.msra.mxu1 %v1355_v3 }
  0x53   : > { %954 = vmatprep.subr.bf16.mxu0 %v1360_v4  ;;  %997 = vmatprep.subr.bf16.mxu1 %v1363_v5 }
  0x56   : > { %955 = vmatpush2.bf16.msra.mxu0 %v1358_v6  ;;  %998 = vmatpush2.bf16.msra.mxu1 %v1361_v7 }
  0x57   : > { %956 = vmatprep.subr.bf16.mxu0 %v1366_v8  ;;  %999 = vmatprep.subr.bf16.mxu1 %v1369_v9 }
  0x5a   : > { %957 = vmatpush2.bf16.msra.mxu0 %v1364_v10  ;;  %1000 = vmatpush2.bf16.msra.mxu1 %v1367_v11  ;;  %v606_v11 = vld [vmem:[%s1905_s4] sm:$0x3] }
  0x5b   : > { %958 = vmatprep.subr.bf16.mxu0 %v1372_v12  ;;  %1001 = vmatprep.subr.bf16.mxu1 %v1375_v13  ;;  %v611_v12 = vrot.slane %v606_v11, %v266_v40  ;;  %v615_v13 = vrot.slane %v606_v11, %v270_v38 }
  0x5e   : > { %959 = vmatpush2.bf16.msra.mxu0 %v1370_v14  ;;  %1002 = vmatpush2.bf16.msra.mxu1 %v1373_v15 }
  0x5f   : > { %960 = vmatprep.subr.bf16.mxu0 %v1378_v16  ;;  %1003 = vmatprep.subr.bf16.mxu1 %v1381_v17 }
  0x62   : > { %961 = vmatpush2.bf16.msra.mxu0 %v1376_v18  ;;  %1004 = vmatpush2.bf16.msra.mxu1 %v1379_v19 }
  0x63   : > { %962 = vmatprep.subr.bf16.mxu0 %v1384_v20  ;;  %1005 = vmatprep.subr.bf16.mxu1 %v1387_v21 }
  0x66   : > { %963 = vmatpush2.bf16.msra.mxu0 %v1382_v22  ;;  %1006 = vmatpush2.bf16.msra.mxu1 %v1385_v23 }
  0x67   : > { %964 = vmatprep.subr.bf16.mxu0 %v1390_v24  ;;  %1007 = vmatprep.subr.bf16.mxu1 %v1393_v25 }
  0x6a   : > { %965 = vmatpush2.bf16.msra.mxu0 %v1388_v26  ;;  %1008 = vmatpush2.bf16.msra.mxu1 %v1391_v27 }
  0x6b   : > { %966 = vmatprep.subr.bf16.mxu0 %v1396_v28  ;;  %1009 = vmatprep.subr.bf16.mxu1 %v1399_v29 }
  0x6e   : > { %967 = vmatpush2.bf16.msra.mxu0 %v1394_v30  ;;  %1010 = vmatpush2.bf16.msra.mxu1 %v1397_v31 }
  0x6f   : > { %968 = vmatprep.subr.bf16.mxu0 %v1402_v32  ;;  %1011 = vmatprep.subr.bf16.mxu1 %v1405_v33 }
  0x72   : > { %969 = vmatpush2.bf16.msra.mxu0 %v1400_v34  ;;  %1012 = vmatpush2.bf16.msra.mxu1 %v1403_v35 }
  0xf5   : > { %v478_v43 = vpop.f32.mrf.mxu0  ;;  %v521_v44 = vpop.f32.mrf.mxu1 }
  0xf6   : > { %v479_v57 = vadd.f32 %v478_v43, %v267_v47  ;;  %v522_v58 = vadd.f32 %v521_v44, %v275_v48 }
  0xf7   : > { %v480_v49 = vpop.f32.mrf.mxu0  ;;  %v523_v50 = vpop.f32.mrf.mxu1 }
  0xf8   : > { %v481_v53 = vadd.f32 %v480_v49, %v271_v45  ;;  %v524_v54 = vadd.f32 %v523_v50, %v279_v46  ;;  %v530_v5 = vmax.f32 %v479_v57, 0.0  ;;  %v532_v6 = vmax.f32 %v522_v58, 0.0 }
  0xf9   : > { %v482_v51 = vpop.f32.mrf.mxu0  ;;  %v525_v52 = vpop.f32.mrf.mxu1 }
  0xfa   : > { %v483_v55 = vadd.f32 %v482_v51, %v267_v47  ;;  %v526_v56 = vadd.f32 %v525_v52, %v275_v48  ;;  %v531_v1 = vmax.f32 %v481_v53, 0.0  ;;  %v533_v2 = vmax.f32 %v524_v54, 0.0 }
  0xfb   : > { %v484_v59 = vpop.f32.mrf.mxu0  ;;  %v527_v60 = vpop.f32.mrf.mxu1 }
  0xfc   : > { %v485_v61 = vadd.f32 %v484_v59, %v271_v45  ;;  %v528_v62 = vadd.f32 %v527_v60, %v279_v46  ;;  %v534_v63 = vmax.f32 %v483_v55, 0.0  ;;  %v536_v0 = vmax.f32 %v526_v56, 0.0 }
  0xfe   : > { %v535_v3 = vmax.f32 %v485_v61, 0.0  ;;  %v537_v4 = vmax.f32 %v528_v62, 0.0  ;;  %v538_v9 = vpack.c.bf16 %v534_v63, %v530_v5  ;;  %v540_v10 = vpack.c.bf16 %v536_v0, %v532_v6 }
 0x100   : > { %v539_v7 = vpack.c.bf16 %v535_v3, %v531_v1  ;;  %v541_v8 = vpack.c.bf16 %v537_v4, %v533_v2 }
 0x102   : > { %970 = vmatprep.mubr.bf16.mxu0 %v539_v7  ;;  %1013 = vmatprep.mubr.bf16.mxu1 %v541_v8 }
 0x103   : > { %971 = vmatmul.mubr.bf16.vlgmr.msra.gmra.mxu0 %v538_v9  ;;  %1014 = vmatmul.mubr.bf16.vlgmr.msra.gmra.mxu1 %v540_v10 }
 0x1c3   : > { %v972_v14 = vpop.f32.mrf.mxu0  ;;  %v1015_v15 = vpop.f32.mrf.mxu1 }
 0x1c4   : > { %v973_v16 = vadd.f32 %v972_v14, %v611_v12 }
 0x1c5   : > { %v974_v17 = vpop.f32.mrf.mxu0  ;;  %v1017_v18 = vpop.f32.mrf.mxu1 }
 0x1c6   : > { %v1016_v19 = vadd.f32 %v1015_v15, %v973_v16  ;;  %v975_v20 = vadd.f32 %v974_v17, %v615_v13 }
 0x1c7   : > { %v976_v21 = vpop.f32.mrf.mxu0  ;;  %v1019_v22 = vpop.f32.mrf.mxu1 }
 0x1c8   : > { %v1024_v23 = vmax.f32 %v1016_v19, 0.0  ;;  %v1018_v24 = vadd.f32 %v1017_v18, %v975_v20  ;;  %v977_v25 = vadd.f32 %v976_v21, %v611_v12 }
 0x1c9   : > { %v978_v26 = vpop.f32.mrf.mxu0  ;;  %v1021_v30 = vpop.f32.mrf.mxu1 }
 0x1ca   : > { %1028 = vst [vmem:[%s218_s17] sm:$0xff] %v1024_v23  ;;  %v1025_v27 = vmax.f32 %v1018_v24, 0.0  ;;  %v1020_v28 = vadd.f32 %v1019_v22, %v977_v25  ;;  %v979_v29 = vadd.f32 %v978_v26, %v615_v13 }
 0x1cc   : > { %1029 = vst [vmem:[%s218_s17 + $0x8] sm:$0xff] %v1025_v27  ;;  %v1026_v31 = vmax.f32 %v1020_v28, 0.0  ;;  %v1022_v32 = vadd.f32 %v1021_v30, %v979_v29 }
 0x1ce   : > { %1030 = vst [vmem:[%s218_s17 + $0x10] sm:$0xff] %v1026_v31  ;;  %v1027_v33 = vmax.f32 %v1022_v32, 0.0 }
 0x1d0   : > { %1031 = vst [vmem:[%s218_s17 + $0x18] sm:$0xff] %v1027_v33 }
 0x1d1   : > { %1419 = shalt.err (!%p1416_p3)
}
 0x1d2   : > { %s1420_s12 = scalar_lea.hbm %s1857_s6, 512  ;;  %s1424_s11 = scalar_lea.hbm %s1906_s5, 1024 }
 0x1d3   : > { %p1421_p4 = scmp.ne.s32.totalorder %s1857_s6, %s1420_s12  ;;  %p1425_p9 = scmp.lt.s32.totalorder %s1857_s6, %s1906_s5 }
 0x1d4   : > { %p1426_p10 = scmp.lt.s32.totalorder %s1424_s11, %s1420_s12 }
 0x1d5   : > { %p1422_p7 = pnand %p1421_p4, %p1540_p5 }
 0x1d6   : > { %p1427_p11 = por %p1426_p10, %p1425_p9 }
 0x1d7   : > { %p1423_p8 = pneg %p1422_p7 }
 0x1d9   : > { %p1428_p12 = pnand %p1427_p11, %p1423_p8 }
 0x1db   : > { %1431 = shalt.err (!%p1428_p12)
}
 0x1dc   : > { %s1470_s17 = smov 256   ;;  %s1471_s26 = smov 16  }
 0x1dd   : > { %1220 = dma.vmem_to_hbm [thread:$0]  (%p1540_p5), %s1852_s23, 512, %s1857_s6, %s1861_s7, %s1470_s17, %s1470_s17, %s1471_s26  }
 0x1de PF: > { %p1226_p13 = scmp.ge.s32.totalorder %s1466_s21, 2  ;;  %s1062_s25 = sand.u32 1, %s1454_s18  }
 0x1df   : > { %s1063_s30 = scalar_lea.sflag [#allocation3], %s1062_s25 }
 0x1e0   : > { %p1223_p0 = pnand %p1226_p13, %p1544_p6 }
 0x1e2   : > { %p1224_p1 = pneg %p1223_p0 }
 0x1e4   : > { %1449 = dma.done.wait (%p1224_p1), %s1063_s30, 512  }
 0x1e5   : > { %1451 = vsyncadd (%p1224_p1), %s1063_s30, 4294966784  ;;  %p15_p2 = scmp.ge.s32.totalorder %s1527_s24, 4   ;;  %s1909_s18 = smov %s1458_s19 }
 0x1e6   : > { %s1910_s19 = smov %s1462_s20  ;;  %s1911_s20 = smov %s1538_s27 }
 0x1e7   : > { %s1912_s21 = smov %s1527_s24  ;;  %17 = sbr.rel (!%p15_p2) target bundleno = 3 (0x3), region = 75 }
 0x1ec   :  { %1068 = vsyncpa [#allocation3], 1 }
 0x1ed   :  { %1070 = vsyncpa [#allocation3 + $0x1], 1 }

</bundles_post_ra>
